<compile_context>
chip_gen: v7x
topology: tpu7x:2x2x1
jax: 0.10.0
libtpu: 0.0.40
codegen_flags: <defaults>
</compile_context>

<pallas_src>
import jax
import jax.numpy as jnp
from jax import lax
from jax.experimental import pallas as pl
from jax.experimental.pallas import tpu as pltpu


def _round_up(v, m):
    return ((v + m - 1) // m) * m


def toy_sae_kernel(x_ref, w_tm_ref, b_tm_ref, w_enc_ref, b_enc_ref,
                   w_dec_ref, b_dec_ref, out_ref):
    """Fused forward: toymodel.encode -> sae.encode -> sae.decode -> toymodel.decode."""
    x = x_ref[...]                                 # (TB, D) bf16
    w_tm = w_tm_ref[...]                           # (D, H) bf16, used twice
    b_dec = b_dec_ref[...]                         # (1, H) f32

    # toymodel.encode: x @ W_tm -> (TB, H), f32 accumulation on the MXU.
    h = jnp.dot(x, w_tm, preferred_element_type=jnp.float32)

    # sae.encode: relu((h - b_dec) @ W_enc + b_enc) -> (TB, F)
    pre = jnp.dot((h - b_dec).astype(jnp.bfloat16), w_enc_ref[...],
                  preferred_element_type=jnp.float32) + b_enc_ref[...]
    z = jnp.maximum(pre, 0.0)

    # sae.decode: z @ W_dec + b_dec -> (TB, H)
    h_rec = jnp.dot(z.astype(jnp.bfloat16), w_dec_ref[...],
                    preferred_element_type=jnp.float32) + b_dec

    # toymodel.decode: relu(h_rec @ W_tm.T + b_tm) -> (TB, D)
    # Contract h_rec's dim 1 against W_tm's dim 1 (no transposed weight copy).
    y = lax.dot_general(h_rec.astype(jnp.bfloat16), w_tm,
                        dimension_numbers=(((1,), (1,)), ((), ())),
                        preferred_element_type=jnp.float32) + b_tm_ref[...]
    out_ref[...] = jnp.maximum(y, 0.0).astype(out_ref.dtype)


def toy_sae_forward(x, w_tm, b_tm, w_enc, b_enc, w_dec, b_dec):
    """Wrapper: pads to MXU/lane-friendly shapes, tiles the batch, calls the kernel.

    x:      (B, input_dim)
    w_tm:   (input_dim, hidden_dim)   toy-model tied weight
    b_tm:   (input_dim,)              toy-model output bias
    w_enc:  (hidden_dim, dict_dim)    SAE encoder weight
    b_enc:  (dict_dim,)               SAE encoder bias
    w_dec:  (dict_dim, hidden_dim)    SAE decoder weight
    b_dec:  (hidden_dim,)             SAE decoder bias (also subtracted pre-encode)
    """
    B, input_dim = x.shape
    hidden_dim = w_tm.shape[1]
    dict_dim = w_enc.shape[1]

    # Zero-pad feature dims to multiples of 128: lane-dense stores + full MXU
    # passes. Zero padding is semantics-preserving; output is sliced back.
    D = _round_up(input_dim, 128)
    H = _round_up(hidden_dim, 128)
    F = _round_up(dict_dim, 128)

    w_tm_p = jnp.zeros((D, H), jnp.bfloat16).at[:input_dim, :hidden_dim].set(
        w_tm.astype(jnp.bfloat16))
    w_enc_p = jnp.zeros((H, F), jnp.bfloat16).at[:hidden_dim, :dict_dim].set(
        w_enc.astype(jnp.bfloat16))
    w_dec_p = jnp.zeros((F, H), jnp.bfloat16).at[:dict_dim, :hidden_dim].set(
        w_dec.astype(jnp.bfloat16))
    b_tm_p = jnp.zeros((1, D), jnp.float32).at[0, :input_dim].set(b_tm.astype(jnp.float32))
    b_enc_p = jnp.zeros((1, F), jnp.float32).at[0, :dict_dim].set(b_enc.astype(jnp.float32))
    b_dec_p = jnp.zeros((1, H), jnp.float32).at[0, :hidden_dim].set(b_dec.astype(jnp.float32))

    # Batch tile: largest multiple of 8 (<= 512) whose footprint fits a 40 MiB
    # budget (v7x has only 64 MiB of physical VMEM per TensorCore).
    weight_bytes = 2 * 2 * (D * H + H * F + F * H)     # bf16 weights, x2 buffering
    bias_bytes = 2 * 4 * (D + H + F)

    def footprint(tb):
        io = 2 * tb * D * (2 + 4)                      # x (bf16) + out (f32), double-buffered
        acts = tb * (H + F + H + D) * 4                # f32 intermediates (h, z, h_rec, y)
        return weight_bytes + bias_bytes + io + acts

    budget = 40 << 20
    TB = 512
    while TB > 8 and footprint(TB) > budget:
        TB //= 2
    TB = min(TB, _round_up(B, 8))
    # TODO(synk): for very large SAEs (padded W_enc+W_dec alone > ~40 MiB, i.e.
    # hidden_dim ~>= 2048 on v7x), add a dict_dim grid axis marked "arbitrary"
    # with a VMEM f32 accumulator instead of the all-weights-resident layout.

    padded_B = _round_up(B, TB)
    x_p = jnp.zeros((padded_B, D), jnp.bfloat16).at[:B, :input_dim].set(
        x.astype(jnp.bfloat16))

    grid = (padded_B // TB,)
    resident = lambda a: pl.BlockSpec(a.shape, lambda i: (0, 0))  # stays in VMEM across grid

    vmem_limit = min(48 << 20, int(1.5 * footprint(TB)) + (4 << 20))

    flops = 2 * padded_B * (D * H + H * F + F * H + H * D)
    bytes_accessed = (padded_B * D * (2 + 4)                       # x in, out out
                      + 2 * (D * H + H * F + F * H)                # bf16 weights
                      + 4 * (D + H + F))                           # f32 biases
    cost = pl.CostEstimate(flops=flops, transcendentals=0,
                           bytes_accessed=bytes_accessed)

    out_p = pl.pallas_call(
        toy_sae_kernel,
        out_shape=jax.ShapeDtypeStruct((padded_B, D), jnp.float32),
        grid=grid,
        in_specs=[
            pl.BlockSpec((TB, D), lambda i: (i, 0)),   # x: streamed over the batch
            resident(w_tm_p), resident(b_tm_p),
            resident(w_enc_p), resident(b_enc_p),
            resident(w_dec_p), resident(b_dec_p),
        ],
        out_specs=pl.BlockSpec((TB, D), lambda i: (i, 0)),
        compiler_params=pltpu.CompilerParams(
            dimension_semantics=("parallel",),          # shard batch grid across v7x's 2 TCs
            vmem_limit_bytes=vmem_limit,
        ),
        cost_estimate=cost,
    )(x_p, w_tm_p, b_tm_p, w_enc_p, b_enc_p, w_dec_p, b_dec_p)

    return out_p[:B, :input_dim].astype(x.dtype)


def toy_sae_reference(x, w_tm, b_tm, w_enc, b_enc, w_dec, b_dec):
    """Pure-JAX f32 reference of the same forward semantics."""
    h = x @ w_tm
    z = jnp.maximum((h - b_dec) @ w_enc + b_enc, 0.0)
    h_rec = z @ w_dec + b_dec
    return jnp.maximum(h_rec @ w_tm.T + b_tm, 0.0)


if __name__ == "__main__":
    # Small shapes consistent with the module: batch=8, input_dim=32,
    # hidden_dim=16, SAE dictionary size = 4 * hidden_dim = 64.
    B, input_dim, hidden_dim = 8, 32, 16
    dict_dim = 4 * hidden_dim

    key = jax.random.PRNGKey(0)
    k_x, k_wtm, k_btm, k_we, k_be, k_wd, k_bd = jax.random.split(key, 7)

    x = jax.random.normal(k_x, (B, input_dim), dtype=jnp.float32)
    w_tm = 0.1 * jax.random.normal(k_wtm, (input_dim, hidden_dim), dtype=jnp.float32)
    b_tm = 0.01 * jax.random.normal(k_btm, (input_dim,), dtype=jnp.float32)
    w_enc = 0.1 * jax.random.normal(k_we, (hidden_dim, dict_dim), dtype=jnp.float32)
    b_enc = 0.01 * jax.random.normal(k_be, (dict_dim,), dtype=jnp.float32)
    w_dec = 0.1 * jax.random.normal(k_wd, (dict_dim, hidden_dim), dtype=jnp.float32)
    b_dec = 0.01 * jax.random.normal(k_bd, (hidden_dim,), dtype=jnp.float32)

    out = toy_sae_forward(x, w_tm, b_tm, w_enc, b_enc, w_dec, b_dec)
    out = jax.block_until_ready(out)

    ref = toy_sae_reference(x, w_tm, b_tm, w_enc, b_enc, w_dec, b_dec)
    assert out.shape == (B, input_dim)
    # bf16 MXU operands with f32 accumulation -> loosened tolerance vs f32 ref.
    assert jnp.allclose(out, ref, atol=2e-2, rtol=2e-2), "mismatch vs reference"

    print("KERNEL_OK")
</pallas_src>

<mosaic_0001>
module attributes {stable_mosaic.version = 11 : i64} {
  func.func @toy_sae_kernel(%arg0: i32, %arg1: memref<8x128xbf16, #tpu.memory_space<vmem>>, %arg2: memref<128x128xbf16, #tpu.memory_space<vmem>>, %arg3: memref<1x128xf32, #tpu.memory_space<vmem>>, %arg4: memref<128x128xbf16, #tpu.memory_space<vmem>>, %arg5: memref<1x128xf32, #tpu.memory_space<vmem>>, %arg6: memref<128x128xbf16, #tpu.memory_space<vmem>>, %arg7: memref<1x128xf32, #tpu.memory_space<vmem>>, %arg8: memref<8x128xf32, #tpu.memory_space<vmem>>) attributes {dimension_semantics = [#tpu.dimension_semantics<parallel>], iteration_bounds = array<i64: 1>, scalar_prefetch = 0 : i64, scratch_operands = 0 : i64, tpu.core_type = #tpu.core_type<tc>, window_params = [{transform_indices = @transform_0, window_bounds = array<i64: 8, 128>}, {pipeline_mode = #tpu.pipeline_mode<synchronous>, transform_indices = @transform_1, window_bounds = array<i64: 128, 128>}, {pipeline_mode = #tpu.pipeline_mode<synchronous>, transform_indices = @transform_2, window_bounds = array<i64: 1, 128>}, {pipeline_mode = #tpu.pipeline_mode<synchronous>, transform_indices = @transform_3, window_bounds = array<i64: 128, 128>}, {pipeline_mode = #tpu.pipeline_mode<synchronous>, transform_indices = @transform_4, window_bounds = array<i64: 1, 128>}, {pipeline_mode = #tpu.pipeline_mode<synchronous>, transform_indices = @transform_5, window_bounds = array<i64: 128, 128>}, {pipeline_mode = #tpu.pipeline_mode<synchronous>, transform_indices = @transform_6, window_bounds = array<i64: 1, 128>}, {transform_indices = @transform_7, window_bounds = array<i64: 8, 128>}]} {
    %c0 = arith.constant 0 : index
    %c0_0 = arith.constant 0 : index
    %0 = vector.load %arg1[%c0, %c0_0] : memref<8x128xbf16, #tpu.memory_space<vmem>>, vector<8x128xbf16>
    %c0_1 = arith.constant 0 : index
    %c0_2 = arith.constant 0 : index
    %1 = vector.load %arg2[%c0_1, %c0_2] : memref<128x128xbf16, #tpu.memory_space<vmem>>, vector<128x128xbf16>
    %c0_3 = arith.constant 0 : index
    %c0_4 = arith.constant 0 : index
    %2 = vector.load %arg7[%c0_3, %c0_4] : memref<1x128xf32, #tpu.memory_space<vmem>>, vector<1x128xf32>
    %cst = arith.constant dense<0.000000e+00> : vector<8x128xf32>
    %3 = tpu.matmul %0, %1, %cst {dimension_numbers = #tpu.dot_dimension_numbers<[1], [0], [0], [1], [0, 0, 1, 1], [], []>} : vector<8x128xbf16>, vector<128x128xbf16>, vector<8x128xf32> -> vector<8x128xf32>
    %4 = vector.broadcast %2 : vector<1x128xf32> to vector<8x128xf32>
    %5 = arith.subf %3, %4 : vector<8x128xf32>
    %6 = arith.truncf %5 : vector<8x128xf32> to vector<8x128xbf16>
    %c0_5 = arith.constant 0 : index
    %c0_6 = arith.constant 0 : index
    %7 = vector.load %arg4[%c0_5, %c0_6] : memref<128x128xbf16, #tpu.memory_space<vmem>>, vector<128x128xbf16>
    %cst_7 = arith.constant dense<0.000000e+00> : vector<8x128xf32>
    %8 = tpu.matmul %6, %7, %cst_7 {dimension_numbers = #tpu.dot_dimension_numbers<[1], [0], [0], [1], [0, 0, 1, 1], [], []>} : vector<8x128xbf16>, vector<128x128xbf16>, vector<8x128xf32> -> vector<8x128xf32>
    %c0_8 = arith.constant 0 : index
    %c0_9 = arith.constant 0 : index
    %9 = vector.load %arg5[%c0_8, %c0_9] : memref<1x128xf32, #tpu.memory_space<vmem>>, vector<1x128xf32>
    %10 = vector.broadcast %9 : vector<1x128xf32> to vector<8x128xf32>
    %11 = arith.addf %8, %10 : vector<8x128xf32>
    %cst_10 = arith.constant 0.000000e+00 : f32
    %12 = vector.broadcast %cst_10 : f32 to vector<8x128xf32>
    %13 = arith.maximumf %11, %12 : vector<8x128xf32>
    %14 = arith.truncf %13 : vector<8x128xf32> to vector<8x128xbf16>
    %c0_11 = arith.constant 0 : index
    %c0_12 = arith.constant 0 : index
    %15 = vector.load %arg6[%c0_11, %c0_12] : memref<128x128xbf16, #tpu.memory_space<vmem>>, vector<128x128xbf16>
    %cst_13 = arith.constant dense<0.000000e+00> : vector<8x128xf32>
    %16 = tpu.matmul %14, %15, %cst_13 {dimension_numbers = #tpu.dot_dimension_numbers<[1], [0], [0], [1], [0, 0, 1, 1], [], []>} : vector<8x128xbf16>, vector<128x128xbf16>, vector<8x128xf32> -> vector<8x128xf32>
    %17 = vector.broadcast %2 : vector<1x128xf32> to vector<8x128xf32>
    %18 = arith.addf %16, %17 : vector<8x128xf32>
    %19 = arith.truncf %18 : vector<8x128xf32> to vector<8x128xbf16>
    %cst_14 = arith.constant dense<0.000000e+00> : vector<8x128xf32>
    %20 = tpu.matmul %19, %1, %cst_14 {dimension_numbers = #tpu.dot_dimension_numbers<[1], [1], [0], [0], [0, 0, 1, 0], [], []>} : vector<8x128xbf16>, vector<128x128xbf16>, vector<8x128xf32> -> vector<8x128xf32>
    %c0_15 = arith.constant 0 : index
    %c0_16 = arith.constant 0 : index
    %21 = vector.load %arg3[%c0_15, %c0_16] : memref<1x128xf32, #tpu.memory_space<vmem>>, vector<1x128xf32>
    %22 = vector.broadcast %21 : vector<1x128xf32> to vector<8x128xf32>
    %23 = arith.addf %20, %22 : vector<8x128xf32>
    %cst_17 = arith.constant 0.000000e+00 : f32
    %24 = vector.broadcast %cst_17 : f32 to vector<8x128xf32>
    %25 = arith.maximumf %23, %24 : vector<8x128xf32>
    %c0_18 = arith.constant 0 : index
    %c0_19 = arith.constant 0 : index
    %26 = vector.load %arg8[%c0_18, %c0_19] : memref<8x128xf32, #tpu.memory_space<vmem>>, vector<8x128xf32>
    tpu.vector_store %arg8[%c0_18, %c0_19], %25 {strides = array<i32>} : memref<8x128xf32, #tpu.memory_space<vmem>>, vector<8x128xf32>,
    return
  }
  func.func @transform_0(%arg0: i32) -> (i32, i32) {
    %c0_i32 = arith.constant 0 : i32
    %c0_i32_0 = arith.constant 0 : i32
    return %arg0, %c0_i32 : i32, i32
  }
  func.func @transform_1(%arg0: i32) -> (i32, i32) {
    %c0_i32 = arith.constant 0 : i32
    %c0_i32_0 = arith.constant 0 : i32
    %c0_i32_1 = arith.constant 0 : i32
    return %c0_i32, %c0_i32_0 : i32, i32
  }
  func.func @transform_2(%arg0: i32) -> (i32, i32) {
    %c0_i32 = arith.constant 0 : i32
    %c0_i32_0 = arith.constant 0 : i32
    %c0_i32_1 = arith.constant 0 : i32
    return %c0_i32, %c0_i32_0 : i32, i32
  }
  func.func @transform_3(%arg0: i32) -> (i32, i32) {
    %c0_i32 = arith.constant 0 : i32
    %c0_i32_0 = arith.constant 0 : i32
    %c0_i32_1 = arith.constant 0 : i32
    return %c0_i32, %c0_i32_0 : i32, i32
  }
  func.func @transform_4(%arg0: i32) -> (i32, i32) {
    %c0_i32 = arith.constant 0 : i32
    %c0_i32_0 = arith.constant 0 : i32
    %c0_i32_1 = arith.constant 0 : i32
    return %c0_i32, %c0_i32_0 : i32, i32
  }
  func.func @transform_5(%arg0: i32) -> (i32, i32) {
    %c0_i32 = arith.constant 0 : i32
    %c0_i32_0 = arith.constant 0 : i32
    %c0_i32_1 = arith.constant 0 : i32
    return %c0_i32, %c0_i32_0 : i32, i32
  }
  func.func @transform_6(%arg0: i32) -> (i32, i32) {
    %c0_i32 = arith.constant 0 : i32
    %c0_i32_0 = arith.constant 0 : i32
    %c0_i32_1 = arith.constant 0 : i32
    return %c0_i32, %c0_i32_0 : i32, i32
  }
  func.func @transform_7(%arg0: i32) -> (i32, i32) {
    %c0_i32 = arith.constant 0 : i32
    %c0_i32_0 = arith.constant 0 : i32
    return %arg0, %c0_i32 : i32, i32
  }
}

</mosaic_0001>

<bundles_post_ra>
// kernel: tpu_custom_call.1
= control target key start
LH: loop header
LB: loop body
LE: loop exit
PB: predicated region body
PF: predicated region fallthrough
CT: control target
= control target key end

     0   :  { %12 = vsyncpa [#allocation3], 0  ;;  %s964_s0 = inlined_call_operand.hbm [shape: bf16[8,128], index: 0, kind: input, shape index: {}]   ;;  %s965_s1 = inlined_call_operand.hbm [shape: bf16[128,128], index: 1, kind: input, shape index: {}]   ;;  %s966_s2 = inlined_call_operand.vmem [shape: f32[1,128], index: 2, kind: input, shape index: {}]   ;;  %s967_s3 = inlined_call_operand.hbm [shape: bf16[128,128], index: 3, kind: input, shape index: {}]   ;;  %s968_s4 = inlined_call_operand.vmem [shape: f32[1,128], index: 4, kind: input, shape index: {}]   ;;  %s969_s5 = inlined_call_operand.hbm [shape: bf16[128,128], index: 5, kind: input, shape index: {}]   ;;  %s970_s6 = inlined_call_operand.vmem [shape: f32[1,128], index: 6, kind: input, shape index: {}]   ;;  %s971_s7 = inlined_call_operand.hbm [shape: f32[8,128], index: 7, kind: output, shape index: {}]  }
   0x1   :  { %13 = vsyncpa [#allocation6], 0 }
   0x2   :  { %14 = vsyncpa [#allocation9], 0 }
   0x3   :  { %15 = vsyncpa [#allocation4], 0  ;;  %s773_s24 = smov [#allocation5]   ;;  %s655_s28 = scalar_lea.hbm %s965_s1, 1024 }
   0x4   :  { %s31_s25 = sshll.u32 %s773_s24, 4  ;;  %p656_p0 = scmp.ne.s32.totalorder %s965_s1, %s655_s28  ;;  %s32_s25 = int_to_ptr.vmem [resolvable:$true] %s31_s25 }
   0x5   :  { %p659_p1 = scmp.lt.u32.totalorder %s655_s28, %s965_s1 }
   0x7   :  { %p661_p2 = pnand %p659_p1, %p656_p0 }
   0x9   :  { %664 = shalt.err (!%p661_p2)
}
   0xa   :  { %s665_s10 = scalar_lea.vmem %s32_s25, 1024  ;;  %p670_p4 = scmp.lt.s32.totalorder %s32_s25, %s32_s25 }
   0xb   :  { %p666_p3 = scmp.ne.s32.totalorder %s32_s25, %s665_s10  ;;  %p671_p5 = scmp.lt.s32.totalorder %s665_s10, %s665_s10 }
   0xd   :  { %p672_p6 = por %p671_p5, %p670_p4 }
   0xf   :  { %p673_p7 = pnand %p672_p6, %p666_p3 }
  0x11   :  { %676 = shalt.err (!%p673_p7)
}
  0x12   :  { %s774_s11 = smov 64   ;;  %s775_s12 = smov 4  }
  0x13   :  { %37 = dma.hbm_to_vmem [thread:$0]  %s965_s1, 1024, %s32_s25, [#allocation6], %s774_s11, %s774_s11, %s775_s12  }
  0x14   :  { %s776_s15 = smov [#allocation2]   ;;  %s777_s17 = smov [#allocation7]  }
  0x15   :  { %s22_s16 = sshll.u32 %s776_s15, 4  ;;  %s45_s18 = sshll.u32 %s777_s17, 4  ;;  %s23_s16 = int_to_ptr.vmem [resolvable:$true] %s22_s16  ;;  %s46_s18 = int_to_ptr.vmem [resolvable:$true] %s45_s18 }
  0x16   :  { %s677_s21 = scalar_lea.hbm %s964_s0, 64 }
  0x17   :  { %p678_p8 = scmp.ne.s32.totalorder %s964_s0, %s677_s21  ;;  %p681_p9 = scmp.lt.u32.totalorder %s677_s21, %s964_s0 }
  0x19   :  { %p683_p10 = pnand %p681_p9, %p678_p8 }
  0x1b   :  { %686 = shalt.err (!%p683_p10)
}
  0x1c   :  { %s687_s1 = scalar_lea.vmem %s23_s16, 64  ;;  %p692_p12 = scmp.lt.s32.totalorder %s23_s16, %s23_s16 }
  0x1d   :  { %p688_p11 = scmp.ne.s32.totalorder %s23_s16, %s687_s1  ;;  %p693_p13 = scmp.lt.s32.totalorder %s687_s1, %s687_s1 }
  0x1f   :  { %p694_p0 = por %p693_p13, %p692_p12 }
  0x21   :  { %p695_p1 = pnand %p694_p0, %p688_p11 }
  0x23   :  { %698 = shalt.err (!%p695_p1)
}
  0x24   :  { %25 = dma.hbm_to_vmem [thread:$0]  %s964_s0, 64, %s23_s16, [#allocation3]  }
  0x25   :  { %s699_s30 = scalar_lea.hbm %s967_s3, 1024 }
  0x26   :  { %p700_p2 = scmp.ne.s32.totalorder %s967_s3, %s699_s30  ;;  %p703_p3 = scmp.lt.u32.totalorder %s699_s30, %s967_s3 }
  0x28   :  { %p705_p4 = pnand %p703_p3, %p700_p2 }
  0x2a   :  { %708 = shalt.err (!%p705_p4)
}
  0x2b   :  { %s709_s14 = scalar_lea.vmem %s46_s18, 1024  ;;  %p714_p6 = scmp.lt.s32.totalorder %s46_s18, %s46_s18 }
  0x2c   :  { %p710_p5 = scmp.ne.s32.totalorder %s46_s18, %s709_s14  ;;  %p715_p7 = scmp.lt.s32.totalorder %s709_s14, %s709_s14 }
  0x2e   :  { %p716_p8 = por %p715_p7, %p714_p6 }
  0x30   :  { %p717_p9 = pnand %p716_p8, %p710_p5 }
  0x32   :  { %720 = shalt.err (!%p717_p9)
}
  0x33   :  { %51 = dma.hbm_to_vmem [thread:$0]  %s967_s3, 1024, %s46_s18, [#allocation6], %s774_s11, %s774_s11, %s775_s12  }
  0x34   :  { %s778_s16 = smov [#allocation8]   ;;  %s721_s21 = scalar_lea.hbm %s969_s5, 1024 }
  0x35   :  { %s59_s17 = sshll.u32 %s778_s16, 4  ;;  %p722_p10 = scmp.ne.s32.totalorder %s969_s5, %s721_s21  ;;  %s60_s17 = int_to_ptr.vmem [resolvable:$true] %s59_s17 }
  0x36   :  { %p725_p11 = scmp.lt.u32.totalorder %s721_s21, %s969_s5 }
  0x38   :  { %p727_p12 = pnand %p725_p11, %p722_p10 }
  0x3a   :  { %730 = shalt.err (!%p727_p12)
}
  0x3b   :  { %s731_s1 = scalar_lea.vmem %s60_s17, 1024  ;;  %p736_p0 = scmp.lt.s32.totalorder %s60_s17, %s60_s17 }
  0x3c   :  { %p732_p13 = scmp.ne.s32.totalorder %s60_s17, %s731_s1  ;;  %p737_p1 = scmp.lt.s32.totalorder %s731_s1, %s731_s1 }
  0x3e   :  { %p738_p2 = por %p737_p1, %p736_p0 }
  0x40   :  { %p739_p3 = pnand %p738_p2, %p732_p13 }
  0x42   :  { %742 = shalt.err (!%p739_p3)
}
  0x43   :  { %65 = dma.hbm_to_vmem [thread:$0]  %s969_s5, 1024, %s60_s17, [#allocation9], %s774_s11, %s774_s11, %s775_s12  }
  0x44   :  { %765 = dma.done.wait [#allocation3], 64  }
  0x45   :  { %766 = vsyncadd [#allocation3], 4294967232 }
  0x46   :  { %767 = dma.done.wait [#allocation6], 2048  }
  0x47   :  { %768 = vsyncadd [#allocation6], 4294965248 }
  0x48   :  { %769 = dma.done.wait [#allocation9], 1024  }
  0x49   :  { %770 = vsyncadd [#allocation9], 4294966272  ;;  %v779_v0 = vmov 0.0   ;;  %vm780_vm0 = vmmov 0   ;;  %v885_v1 = vld [vmem:[#allocation5] sm:$0xff]   ;;  %v888_v2 = vld [vmem:[#allocation5 + $0x8] sm:$0xff]  }
  0x4a   :  { %542 = vmatprep.subr.bf16.mxu0 %v779_v0  ;;  %558 = vmatprep.mubr.msk.bf16.mxu0 %vm780_vm0, %v779_v0  ;;  %v892_v3 = vld [vmem:[#allocation5 + $0x10] sm:$0xff]   ;;  %v639_v4 = vld [vmem:[#allocation7] sm:$0xff]   ;;  %v896_v5 = vld [vmem:[#allocation5 + $0x18] sm:$0xff]  }
  0x4b   :  { %562 = vmatprep.subr.bf16.mxu1 %v779_v0  ;;  %578 = vmatprep.mubr.msk.bf16.mxu1 %vm780_vm0, %v779_v0  ;;  %v640_v6 = vld [vmem:[#allocation7 + $0x8] sm:$0xff]   ;;  %v901_v7 = vld [vmem:[#allocation5 + $0x20] sm:$0xff]   ;;  %v641_v8 = vld [vmem:[#allocation7 + $0x10] sm:$0xff]  }
  0x4c   :  { %543 = vmatpush3.bf16.msra.mxu0 %v885_v1  ;;  %563 = vmatpush3.bf16.msra.mxu1 %v639_v4  ;;  %v904_v9 = vld [vmem:[#allocation5 + $0x28] sm:$0xff]   ;;  %v642_v10 = vld [vmem:[#allocation7 + $0x18] sm:$0xff]   ;;  %v637_v11 = vld [vmem:[#allocation5 + $0x30] sm:$0xff]  }
  0x4d   :  { %544 = vmatprep.subr.bf16.mxu0 %v779_v0  ;;  %564 = vmatprep.subr.bf16.mxu1 %v779_v0  ;;  %v643_v12 = vld [vmem:[#allocation7 + $0x20] sm:$0xff]   ;;  %v638_v13 = vld [vmem:[#allocation5 + $0x38] sm:$0xff]   ;;  %v644_v14 = vld [vmem:[#allocation7 + $0x28] sm:$0xff]  }
  0x4e   :  { %v81_v15 = vld [vmem:[#allocation2] sm:$0xf]  ;;  %v645_v16 = vld [vmem:[#allocation7 + $0x30] sm:$0xff]   ;;  %v647_v18 = vld [vmem:[#allocation8] sm:$0xff]  }
  0x4f   :  { %v646_v17 = vld [vmem:[#allocation7 + $0x38] sm:$0xff]   ;;  %v648_v19 = vld [vmem:[#allocation8 + $0x8] sm:$0xff]   ;;  %v649_v20 = vld [vmem:[#allocation8 + $0x10] sm:$0xff]  }
  0x50   :  { %545 = vmatpush3.bf16.msra.mxu0 %v888_v2  ;;  %565 = vmatpush3.bf16.msra.mxu1 %v640_v6  ;;  %v650_v21 = vld [vmem:[#allocation8 + $0x18] sm:$0xff]   ;;  %v651_v22 = vld [vmem:[#allocation8 + $0x20] sm:$0xff]   ;;  %v652_v23 = vld [vmem:[#allocation8 + $0x28] sm:$0xff]  }
  0x51   :  { %546 = vmatprep.subr.bf16.mxu0 %v779_v0  ;;  %566 = vmatprep.subr.bf16.mxu1 %v779_v0  ;;  %v487_v24 = vld [vmem:[%s970_s6] ss:$0 sm:$0xff]  ;;  %v653_v31 = vld [vmem:[#allocation8 + $0x30] sm:$0xff]  }
  0x52   :  { %v654_v32 = vld [vmem:[#allocation8 + $0x38] sm:$0xff]  }
  0x53   :  { %v488_v33 = vld [vmem:[%s968_s4] ss:$0 sm:$0xff]  ;;  %s781_s4 = smov [#allocation10]  }
  0x54   :  { %547 = vmatpush3.bf16.msra.mxu0 %v892_v3  ;;  %567 = vmatpush3.bf16.msra.mxu1 %v641_v8  ;;  %v505_v47 = vld [vmem:[%s966_s2] ss:$0 sm:$0xff]  ;;  %s468_s28 = sshll.u32 %s781_s4, 4  ;;  %s469_s28 = int_to_ptr.vmem [resolvable:$true] %s468_s28 }
  0x55   :  { %548 = vmatprep.subr.bf16.mxu0 %v779_v0  ;;  %568 = vmatprep.subr.bf16.mxu1 %v779_v0  ;;  %s743_s29 = scalar_lea.vmem %s469_s28, 128  ;;  %p748_p5 = scmp.lt.s32.totalorder %s469_s28, %s469_s28 }
  0x56   :  { %p744_p4 = scmp.ne.s32.totalorder %s469_s28, %s743_s29  ;;  %p749_p6 = scmp.lt.s32.totalorder %s743_s29, %s743_s29 }
  0x58   :  { %549 = vmatpush3.bf16.msra.mxu0 %v896_v5  ;;  %569 = vmatpush3.bf16.msra.mxu1 %v642_v10  ;;  %p750_p7 = por %p749_p6, %p748_p5 }
  0x59   :  { %550 = vmatprep.subr.bf16.mxu0 %v779_v0  ;;  %570 = vmatprep.subr.bf16.mxu1 %v779_v0 }
  0x5a   :  { %p751_p8 = pnand %p750_p7, %p744_p4 }
  0x5c   :  { %551 = vmatpush3.bf16.msra.mxu0 %v901_v7  ;;  %571 = vmatpush3.bf16.msra.mxu1 %v643_v12 }
  0x5d   :  { %552 = vmatprep.subr.bf16.mxu0 %v779_v0  ;;  %572 = vmatprep.subr.bf16.mxu1 %v779_v0 }
  0x60   :  { %553 = vmatpush3.bf16.msra.mxu0 %v904_v9  ;;  %573 = vmatpush3.bf16.msra.mxu1 %v644_v14 }
  0x61   :  { %554 = vmatprep.subr.bf16.mxu0 %v779_v0  ;;  %574 = vmatprep.subr.bf16.mxu1 %v779_v0 }
  0x64   :  { %555 = vmatpush3.bf16.msra.mxu0 %v637_v11  ;;  %575 = vmatpush3.bf16.msra.mxu1 %v645_v16 }
  0x65   :  { %556 = vmatprep.subr.bf16.mxu0 %v779_v0  ;;  %576 = vmatprep.subr.bf16.mxu1 %v779_v0 }
  0x68   :  { %557 = vmatpush3.bf16.msra.mxu0 %v638_v13  ;;  %577 = vmatpush3.bf16.msra.mxu1 %v646_v17 }
  0x69   :  { %582 = vmatprep.subr.bf16.mxu0 %v779_v0  ;;  %602 = vmatprep.subr.bf16.mxu1 %v779_v0 }
  0x6b   :  { %559 = vmatmul.mubr.bf16.vlgmr.msra.gmra.mrb[0].mxu0 %v81_v15 }
  0x6c   :  { %598 = vmatprep.mubr.msk.bf16.mxu0 %vm780_vm0, %v779_v0  ;;  %583 = vmatpush3.bf16.msra.mxu0 %v647_v18 }
  0x6d   :  { %584 = vmatprep.subr.bf16.mxu0 %v779_v0 }
  0x70   :  { %585 = vmatpush3.bf16.msra.mxu0 %v648_v19 }
  0x71   :  { %586 = vmatprep.subr.bf16.mxu0 %v779_v0 }
  0x74   :  { %587 = vmatpush3.bf16.msra.mxu0 %v649_v20 }
  0x75   :  { %588 = vmatprep.subr.bf16.mxu0 %v779_v0 }
  0x78   :  { %589 = vmatpush3.bf16.msra.mxu0 %v650_v21 }
  0x79   :  { %590 = vmatprep.subr.bf16.mxu0 %v779_v0 }
  0x7c   :  { %591 = vmatpush3.bf16.msra.mxu0 %v651_v22 }
  0x7d   :  { %592 = vmatprep.subr.bf16.mxu0 %v779_v0 }
  0x80   :  { %593 = vmatpush3.bf16.msra.mxu0 %v652_v23 }
  0x81   :  { %594 = vmatprep.subr.bf16.mxu0 %v779_v0 }
  0x84   :  { %595 = vmatpush3.bf16.msra.mxu0 %v653_v31 }
  0x85   :  { %596 = vmatprep.subr.bf16.mxu0 %v779_v0 }
  0x88   :  { %597 = vmatpush3.bf16.msra.mxu0 %v654_v32 }
 0x13e   :  { %v181_v25 = vpop.f32.mrb[0].mxu0 }
 0x13f   :  { %v193_v26 = vsub.f32 %v181_v25, %v487_v24  ;;  %v560_v27 = vpop.f32.mrb[1].mxu0 }
 0x140   :  { %v184_v28 = vpop.f32.mrb[2].mxu0 }
 0x141   :  { %v194_v29 = vpack.c.bf16 %v193_v26, %v193_v26  ;;  %v561_v30 = vpop.f32.mrb[3].mxu0 }
 0x143   :  { %579 = vmatmul.mubr.bf16.vlgmr.msra.gmra.mrb[0].mxu1 %v194_v29 }
 0x144   :  { %603 = vmatpush3.bf16.xpose.msra.mxu1 %v885_v1  ;;  %618 = vmatprep.mubr.msk.bf16.mxu1 %vm780_vm0, %v779_v0 }
 0x145   :  { %604 = vmatprep.subr.bf16.mxu1 %v779_v0 }
 0x14c   :  { %605 = vmatpush3.bf16.xpose.msra.mxu1 %v888_v2 }
 0x14d   :  { %606 = vmatprep.subr.bf16.mxu1 %v779_v0 }
 0x154   :  { %607 = vmatpush3.bf16.xpose.msra.mxu1 %v892_v3 }
 0x155   :  { %608 = vmatprep.subr.bf16.mxu1 %v779_v0 }
 0x15c   :  { %609 = vmatpush3.bf16.xpose.msra.mxu1 %v896_v5 }
 0x15d   :  { %610 = vmatprep.subr.bf16.mxu1 %v779_v0 }
 0x164   :  { %611 = vmatpush3.bf16.xpose.msra.mxu1 %v901_v7 }
 0x165   :  { %612 = vmatprep.subr.bf16.mxu1 %v779_v0 }
 0x16c   :  { %613 = vmatpush3.bf16.xpose.msra.mxu1 %v904_v9 }
 0x16d   :  { %614 = vmatprep.subr.bf16.mxu1 %v779_v0 }
 0x174   :  { %615 = vmatpush3.bf16.xpose.msra.mxu1 %v637_v11 }
 0x175   :  { %616 = vmatprep.subr.bf16.mxu1 %v779_v0 }
 0x17c   :  { %617 = vmatpush3.bf16.xpose.msra.mxu1 %v638_v13 }
 0x216   :  { %v300_v34 = vpop.f32.mrb[0].mxu1 }
 0x217   :  { %v301_v35 = vadd.f32 %v488_v33, %v300_v34  ;;  %v580_v36 = vpop.f32.mrb[1].mxu1 }
 0x218   :  { %v303_v37 = vpop.f32.mrb[2].mxu1 }
 0x219   :  { %v306_v38 = vmax.f32 %v301_v35, 0.0  ;;  %v581_v39 = vpop.f32.mrb[3].mxu1 }
 0x21b   :  { %v307_v40 = vpack.c.bf16 %v306_v38, %v306_v38 }
 0x21d   :  { %599 = vmatmul.mubr.bf16.vlgmr.msra.gmra.mrb[4].mxu0 %v307_v40 }
 0x2f0   :  { %v406_v41 = vpop.f32.mrb[4].mxu0 }
 0x2f1   :  { %v407_v42 = vadd.f32 %v487_v24, %v406_v41  ;;  %v600_v43 = vpop.f32.mrb[5].mxu0 }
 0x2f2   :  { %v409_v44 = vpop.f32.mrb[6].mxu0 }
 0x2f3   :  { %v412_v45 = vpack.c.bf16 %v407_v42, %v407_v42  ;;  %v601_v46 = vpop.f32.mrb[7].mxu0 }
 0x2f5   :  { %619 = vmatmul.mubr.bf16.vlgmr.msra.gmra.mrb[4].mxu1 %v412_v45 }
 0x3c8   :  { %v454_v48 = vpop.f32.mrb[4].mxu1 }
 0x3c9   :  { %v455_v49 = vadd.f32 %v505_v47, %v454_v48  ;;  %v620_v50 = vpop.f32.mrb[5].mxu1 }
 0x3ca   :  { %v457_v51 = vpop.f32.mrb[6].mxu1 }
 0x3cb   :  { %v460_v52 = vmax.f32 %v455_v49, 0.0  ;;  %v621_v53 = vpop.f32.mrb[7].mxu1 }
 0x3cd   :  { %461 = vst [vmem:[#allocation10] sm:$0xff] %v460_v52 }
 0x3ce   :  { %754 = shalt.err (!%p751_p8)
}
 0x3cf   :  { %s755_s2 = scalar_lea.hbm %s971_s7, 128 }
 0x3d0   :  { %p756_p9 = scmp.ne.s32.totalorder %s971_s7, %s755_s2  ;;  %p759_p10 = scmp.lt.u32.totalorder %s755_s2, %s971_s7 }
 0x3d2   :  { %p761_p11 = pnand %p759_p10, %p756_p9 }
 0x3d4   :  { %764 = shalt.err (!%p761_p11)
}
 0x3d5   :  { %471 = dma.vmem_to_hbm [thread:$0]  %s469_s28, 128, %s971_s7, [#allocation4]  }
 0x3d6   :  { %771 = dma.done.wait [#allocation4], 128  }
 0x3d7   :  { %772 = vsyncadd [#allocation4], 4294967168 }
 0x3d8   :  { %475 = vsyncpa [#allocation3], 1 }
 0x3d9   :  { %476 = vsyncpa [#allocation6], 1 }
 0x3da   :  { %477 = vsyncpa [#allocation9], 1 }
 0x3db   :  { %478 = vsyncpa [#allocation4], 1 }

</bundles_post_ra>
